<compile_context>
chip_gen: v6e
topology: v6e:2x2x1
jax: 0.10.0
libtpu: 0.0.40
codegen_flags: <defaults>
</compile_context>

<pallas_src>
import numpy as np
import jax
import jax.numpy as jnp
from jax.experimental import pallas as pl
from jax.experimental.pallas import tpu as pltpu

_TARGET_BLOCK_BYTES = 1 << 20  # ~1 MiB blocks: >=85% of HBM roofline


def _round_up(n, m):
    return ((n + m - 1) // m) * m


def _sublane_pack(dtype):
    # rows per vreg sublane group: 8 for 32-bit, 16 for 16-bit, 32 for 8-bit
    return max(8, 32 // jnp.dtype(dtype).itemsize)


# ----------------------------------------------------------------------------
# Minor-axis flip kernel: output block j = reverse(input block nfb-1-j).
# Within-block reversal is done 128 lanes at a time via an anti-diagonal
# (128,128) 0/1 permutation on the MXU, writing to the mirrored 128-lane slot.
# ----------------------------------------------------------------------------
def _flip_minor_kernel(x_ref, o_ref):
    # Tiny loop-invariant permutation, generated in-registers (no HBM stream).
    row = jax.lax.broadcasted_iota(jnp.int32, (128, 128), 0)
    col = jax.lax.broadcasted_iota(jnp.int32, (128, 128), 1)
    perm = (row + col == 127).astype(x_ref.dtype)
    # Dtype-gated precision: HIGHEST only where needed for exact 0/1 selection.
    prec = (jax.lax.Precision.DEFAULT if x_ref.dtype == jnp.bfloat16
            else jax.lax.Precision.HIGHEST)
    nsub = o_ref.shape[-1] // 128
    for s in range(nsub):                      # static, fully unrolled
        src = x_ref[:, (nsub - 1 - s) * 128:(nsub - s) * 128]
        o_ref[:, s * 128:(s + 1) * 128] = jnp.dot(
            src, perm, preferred_element_type=jnp.float32,
            precision=prec).astype(o_ref.dtype)


def _flip_minor_2d(x2):
    """Reverse the last (lane) axis of a 2-D array."""
    B, D = x2.shape
    itemsize = jnp.dtype(x2.dtype).itemsize
    pack = _sublane_pack(x2.dtype)

    # Lane padding only when required; pad on the LEFT so the final slice is
    # the offset-0, lane-aligned out[:, :D].
    # TODO(synk): handle the ragged D%128 edge with one masked in-kernel block
    # instead of a padded copy to drop the extra HBM pass in that case too.
    Dp = _round_up(D, 128)
    pad_cols = Dp - D
    xp = jnp.pad(x2, ((0, 0), (pad_cols, 0))) if pad_cols else x2

    # Feature tile: the largest multiple of 128 that divides Dp, capped at 1024
    # (wide contiguous DMA runs per row).
    nb128 = Dp // 128
    k = 1
    for cand in range(min(8, nb128), 0, -1):
        if nb128 % cand == 0:
            k = cand
            break
    tf = 128 * k
    nfb = Dp // tf

    # Row tile: ~1 MiB blocks, sublane-packing aligned; no row padding — the
    # ragged last row block is handled by Pallas boundary masking.
    tb = max(pack, (_TARGET_BLOCK_BYTES // (tf * itemsize)) // pack * pack)
    tb = min(tb, _round_up(B, pack))
    nrb = pl.cdiv(B, tb)

    out = pl.pallas_call(
        _flip_minor_kernel,
        out_shape=jax.ShapeDtypeStruct((B, Dp), x2.dtype),
        grid_spec=pltpu.PrefetchScalarGridSpec(
            num_scalar_prefetch=0,
            grid=(nrb, nfb),
            in_specs=[
                # reversed block order along the feature axis (free in the DMA)
                pl.BlockSpec((tb, tf), lambda i, j: (i, nfb - 1 - j)),
            ],
            out_specs=pl.BlockSpec((tb, tf), lambda i, j: (i, j)),
        ),
        compiler_params=pltpu.CompilerParams(
            dimension_semantics=("parallel", "parallel")),
    )(xp)

    return out[:, :D] if pad_cols else out


# ----------------------------------------------------------------------------
# Non-minor flip axis: pure copy kernel; reversal lives entirely in the
# index_map (no transposes, no MXU, exact for every dtype).
# ----------------------------------------------------------------------------
def _flip_copy_kernel(x_ref, o_ref):
    o_ref[...] = x_ref[...]


def _flip_middle_3d(x3):
    """Reverse the middle axis of a (P, L, S) array (S > 1)."""
    P, L, S = x3.shape
    itemsize = jnp.dtype(x3.dtype).itemsize

    # Present the suffix lane-dense when possible (free, layout-preserving).
    if S % 128 == 0:
        sr, sc = S // 128, 128
    else:
        sr, sc = 1, S
    x4 = x3.reshape(P, L, sr, sc)

    tP = max(1, _TARGET_BLOCK_BYTES // (S * itemsize))
    tP = min(tP, P)
    nPb = pl.cdiv(P, tP)

    out = pl.pallas_call(
        _flip_copy_kernel,
        out_shape=jax.ShapeDtypeStruct((P, L, sr, sc), x3.dtype),
        grid_spec=pltpu.PrefetchScalarGridSpec(
            num_scalar_prefetch=0,
            grid=(nPb, L),
            in_specs=[
                pl.BlockSpec((tP, 1, sr, sc),
                             lambda p, l: (p, L - 1 - l, 0, 0)),
            ],
            out_specs=pl.BlockSpec((tP, 1, sr, sc),
                                   lambda p, l: (p, l, 0, 0)),
        ),
        compiler_params=pltpu.CompilerParams(
            dimension_semantics=("parallel", "parallel")),
    )(x4)

    return out.reshape(P, L, S)


# ----------------------------------------------------------------------------
# FlipFlow.forward((x, logdet, context)) with flip axis `dim`
# ----------------------------------------------------------------------------
def flip_flow_forward(inputs, dim=1):
    x, logdet, context = inputs
    d = dim % x.ndim
    shape = x.shape
    L = shape[d]

    if x.size == 0 or L <= 1:                 # flip is the identity
        return x, logdet, context

    P = int(np.prod(shape[:d])) if d > 0 else 1
    S = int(np.prod(shape[d + 1:])) if d + 1 < x.ndim else 1

    if S == 1:
        # Flip axis is the innermost contiguous axis -> MXU permutation path.
        # TODO(synk): integer dtypes on this path go through f32 accumulation;
        # use the copy path semantics for exact integer flips if ever needed.
        y = _flip_minor_2d(x.reshape(P, L)).reshape(shape)
    else:
        # Flip axis is not innermost -> reversed-index_map copy path.
        y = _flip_middle_3d(x.reshape(P, L, S)).reshape(shape)

    return y, logdet, context


if __name__ == "__main__":
    key = jax.random.PRNGKey(0)
    kx, kc, k2, k3, k4, k5 = jax.random.split(key, 6)

    # --- case 1: canonical flow usage: (batch, features), flip along dim=1 ---
    B, D, CDIM = 16, 8, 8
    x = jax.random.normal(kx, (B, D), jnp.float32)
    logdet = jnp.zeros((B,), jnp.float32)
    context = jax.random.normal(kc, (B, CDIM), jnp.float32)

    y, logdet_out, ctx_out = flip_flow_forward((x, logdet, context), dim=1)
    jax.block_until_ready(y)
    assert y.shape == x.shape and y.dtype == x.dtype
    np.testing.assert_allclose(np.asarray(y), np.asarray(jnp.flip(x, axis=1)),
                               rtol=1e-6, atol=1e-6)
    np.testing.assert_array_equal(np.asarray(logdet_out), np.asarray(logdet))
    np.testing.assert_array_equal(np.asarray(ctx_out), np.asarray(context))

    # --- case 2: ragged feature axis (D % 128 != 0), minor-axis path ---------
    x_b = jax.random.normal(k2, (4, 300), jnp.float32)
    y_b, _, _ = flip_flow_forward((x_b, logdet[:4], context[:4]), dim=1)
    jax.block_until_ready(y_b)
    np.testing.assert_allclose(np.asarray(y_b),
                               np.asarray(jnp.flip(x_b, axis=1)),
                               rtol=1e-6, atol=1e-6)

    # --- case 3: higher-rank input, flip along a middle axis (copy path) -----
    x_c = jax.random.normal(k3, (2, 6, 16), jnp.float32)
    y_c, _, _ = flip_flow_forward((x_c, logdet[:2], context[:2]), dim=1)
    jax.block_until_ready(y_c)
    np.testing.assert_allclose(np.asarray(y_c),
                               np.asarray(jnp.flip(x_c, axis=1)),
                               rtol=1e-6, atol=1e-6)

    # --- case 4: middle axis with lane-dense suffix (S % 128 == 0) -----------
    x_d = jax.random.normal(k4, (2, 3, 256), jnp.float32)
    y_d, _, _ = flip_flow_forward((x_d, logdet[:2], context[:2]), dim=1)
    jax.block_until_ready(y_d)
    np.testing.assert_allclose(np.asarray(y_d),
                               np.asarray(jnp.flip(x_d, axis=1)),
                               rtol=1e-6, atol=1e-6)

    # --- case 5: bfloat16 input, dtype-gated DEFAULT precision on the MXU ----
    x_e = jax.random.normal(k5, (8, 256), jnp.float32).astype(jnp.bfloat16)
    y_e, _, _ = flip_flow_forward((x_e, logdet[:8], context[:8]), dim=1)
    jax.block_until_ready(y_e)
    np.testing.assert_allclose(
        np.asarray(y_e.astype(jnp.float32)),
        np.asarray(jnp.flip(x_e, axis=1).astype(jnp.float32)),
        rtol=1e-2, atol=1e-2)

    print("KERNEL_OK")
</pallas_src>

<mosaic_0001>
module attributes {stable_mosaic.version = 11 : i64} {
  func.func @_flip_minor_kernel(%arg0: i32, %arg1: i32, %arg2: memref<16x128xf32, #tpu.memory_space<vmem>>, %arg3: memref<16x128xf32, #tpu.memory_space<vmem>>) attributes {dimension_semantics = [#tpu.dimension_semantics<parallel>, #tpu.dimension_semantics<parallel>], iteration_bounds = array<i64: 1, 1>, scalar_prefetch = 0 : i64, scratch_operands = 0 : i64, tpu.core_type = #tpu.core_type<tc>, window_params = [{transform_indices = @transform_0, window_bounds = array<i64: 16, 128>}, {transform_indices = @transform_1, window_bounds = array<i64: 16, 128>}]} {
    %0 = tpu.iota {dimensions = array<i32: 0>} : vector<128x128xi32>
    %1 = tpu.iota {dimensions = array<i32: 1>} : vector<128x128xi32>
    %2 = arith.addi %0, %1 : vector<128x128xi32>
    %c127_i32 = arith.constant 127 : i32
    %3 = vector.broadcast %c127_i32 : i32 to vector<128x128xi32>
    %4 = arith.cmpi eq, %2, %3 : vector<128x128xi32>
    %5 = arith.extui %4 : vector<128x128xi1> to vector<128x128xi32>
    %6 = arith.sitofp %5 : vector<128x128xi32> to vector<128x128xf32>
    %c0 = arith.constant 0 : index
    %c0_0 = arith.constant 0 : index
    %7 = vector.load %arg2[%c0, %c0_0] : memref<16x128xf32, #tpu.memory_space<vmem>>, vector<16x128xf32>
    %cst = arith.constant dense<0.000000e+00> : vector<16x128xf32>
    %8 = tpu.matmul %7, %6, %cst {dimension_numbers = #tpu.dot_dimension_numbers<[1], [0], [0], [1], [0, 0, 1, 1], [], []>, precision = #tpu.contract_precision<fp32>} : vector<16x128xf32>, vector<128x128xf32>, vector<16x128xf32> -> vector<16x128xf32>
    %c0_1 = arith.constant 0 : index
    %c0_2 = arith.constant 0 : index
    %9 = vector.load %arg3[%c0_1, %c0_2] : memref<16x128xf32, #tpu.memory_space<vmem>>, vector<16x128xf32>
    tpu.vector_store %arg3[%c0_1, %c0_2], %8 {strides = array<i32>} : memref<16x128xf32, #tpu.memory_space<vmem>>, vector<16x128xf32>,
    return
  }
  func.func @transform_0(%arg0: i32, %arg1: i32) -> (i32, i32) {
    %c0_i32 = arith.constant 0 : i32
    %0 = arith.subi %c0_i32, %arg1 : i32
    %c0_i32_0 = arith.constant 0 : i32
    return %arg0, %0 : i32, i32
  }
  func.func @transform_1(%arg0: i32, %arg1: i32) -> (i32, i32) {
    %c0_i32 = arith.constant 0 : i32
    return %arg0, %arg1 : i32, i32
  }
}

</mosaic_0001>

<bundles_post_ra>
// kernel: tpu_custom_call.1
= control target key start
LH: loop header
LB: loop body
LE: loop exit
PB: predicated region body
PF: predicated region fallthrough
CT: control target
= control target key end

     0   :  { %6 = vsyncpa [#allocation3], 0  ;;  %s1903_s0 = inlined_call_operand.hbm [shape: f32[16,128], index: 0, kind: input, shape index: {}]   ;;  %s1904_s1 = inlined_call_operand.hbm [shape: f32[16,128], index: 1, kind: output, shape index: {}]  }
   0x1   :  { %7 = vsyncpa [#allocation4], 0  ;;  %s1249_s6 = smov [#allocation2]  }
   0x2   :  { %s16_s7 = sshll.u32 %s1249_s6, 4  ;;  %s17_s7 = int_to_ptr.vmem [resolvable:$true] %s16_s7 }
   0x3   :  { %s1213_s8 = scalar_lea.vmem %s17_s7, 256  ;;  %p1218_p1 = scmp.lt.s32.totalorder %s17_s7, %s17_s7 }
   0x4   :  { %p1214_p0 = scmp.ne.s32.totalorder %s17_s7, %s1213_s8  ;;  %p1219_p2 = scmp.lt.s32.totalorder %s1213_s8, %s1213_s8 }
   0x6   :  { %p1220_p3 = por %p1219_p2, %p1218_p1 }
   0x8   :  { %p1221_p4 = pnand %p1220_p3, %p1214_p0 }
   0xa   :  { %1224 = shalt.err (!%p1221_p4)
}
   0xb   :  { %s1250_s9 = smov 128   ;;  %s1251_s10 = smov 8   ;;  %v27_v0 = vlaneseq }
   0xc   :  { %22 = dma.hbm_to_vmem [thread:$0]  %s1903_s0, 256, %s17_s7, [#allocation3], %s1250_s9, %s1250_s9, %s1251_s10  }
   0xd   :  { %1245 = dma.done.wait [#allocation3], 256  }
   0xe   :  { %1246 = vsyncadd [#allocation3], 4294967040  ;;  %v1271_v1 = vshrl.u32 %v27_v0, 7  ;;  %v1273_v2 = vand.u32 127, %v27_v0  ;;  %v1252_v18 = vmov 1.0   ;;  %v1253_v19 = vmov 0.0  }
   0xf   :  { %s1254_s0 = smov [#allocation5]  }
  0x10   :  { %v43_v3 = vadd.s32 120, %v1271_v1  ;;  %v42_v4 = vadd.s32 112, %v1271_v1  ;;  %v41_v5 = vadd.s32 104, %v1271_v1  ;;  %v40_v6 = vadd.s32 96, %v1271_v1  ;;  %s803_s13 = sshll.u32 %s1254_s0, 4  ;;  %s804_s13 = int_to_ptr.vmem [resolvable:$true] %s803_s13 }
  0x11   :  { %v39_v7 = vadd.s32 88, %v1271_v1  ;;  %v38_v8 = vadd.s32 80, %v1271_v1  ;;  %v37_v9 = vadd.s32 72, %v1271_v1  ;;  %v36_v10 = vadd.s32 64, %v1271_v1  ;;  %s1225_s14 = scalar_lea.vmem %s804_s13, 256  ;;  %p1230_p6 = scmp.lt.s32.totalorder %s804_s13, %s804_s13 }
  0x12   :  { %v1284_v11 = vadd.s32 %v1273_v2, %v43_v3  ;;  %v1287_v12 = vadd.s32 %v1273_v2, %v42_v4  ;;  %v1290_v13 = vadd.s32 %v1273_v2, %v41_v5  ;;  %v1293_v14 = vadd.s32 %v1273_v2, %v40_v6  ;;  %p1226_p5 = scmp.ne.s32.totalorder %s804_s13, %s1225_s14  ;;  %p1231_p7 = scmp.lt.s32.totalorder %s1225_s14, %s1225_s14 }
  0x13   :  { %v1296_v15 = vadd.s32 %v1273_v2, %v39_v7  ;;  %v1299_v16 = vadd.s32 %v1273_v2, %v38_v8  ;;  %v1302_v17 = vadd.s32 %v1273_v2, %v37_v9  ;;  %v1319_v22 = vadd.s32 %v1273_v2, %v36_v10 }
  0x14   :  { %vm77_vm0 = vcmp.eq.s32.totalorder %v1284_v11, 127  ;;  %vm76_vm1 = vcmp.eq.s32.totalorder %v1287_v12, 127  ;;  %vm75_vm2 = vcmp.eq.s32.totalorder %v1290_v13, 127  ;;  %vm74_vm3 = vcmp.eq.s32.totalorder %v1293_v14, 127  ;;  %p1232_p8 = por %p1231_p7, %p1230_p6 }
  0x15   :  { %989 = vmatprep.subr.msk.mxu0 %vm77_vm0, %v1252_v18  ;;  %vm73_vm4 = vcmp.eq.s32.totalorder %v1296_v15, 127  ;;  %v832_v20 = vsel %vm77_vm0, 1.0, %v1253_v19  ;;  %v831_v21 = vsel %vm76_vm1, 1.0, %v1253_v19  ;;  %vm72_vm5 = vcmp.eq.s32.totalorder %v1299_v16, 127 }
  0x16   :  { %990 = vmatpush3.msk.msra.mxu0 %vm77_vm0, %v1252_v18  ;;  %v1324_v23 = vsub.f32 %v832_v20, %v832_v20  ;;  %v1327_v24 = vsub.f32 %v831_v21, %v831_v21  ;;  %v830_v25 = vsel %vm75_vm2, 1.0, %v1253_v19  ;;  %vm71_vm6 = vcmp.eq.s32.totalorder %v1302_v17, 127  ;;  %p1233_p9 = pnand %p1232_p8, %p1226_p5 }
  0x17   :  { %991 = vmatprep.subr.msk.mxu0 %vm76_vm1, %v1252_v18  ;;  %v1336_v26 = vsub.f32 %v830_v25, %v830_v25  ;;  %v829_v27 = vsel %vm74_vm3, 1.0, %v1253_v19  ;;  %v35_v28 = vadd.s32 56, %v1271_v1  ;;  %v828_v32 = vsel %vm73_vm4, 1.0, %v1253_v19 }
  0x18   :  { %992 = vmatpush3.msk.msra.mxu0 %vm76_vm1, %v1252_v18  ;;  %v1346_v29 = vand.u32 4294901760, %v1324_v23  ;;  %v1349_v30 = vand.u32 4294901760, %v1327_v24  ;;  %v1351_v31 = vsub.f32 %v829_v27, %v829_v27  ;;  %v1365_v35 = vsub.f32 %v828_v32, %v828_v32  ;;  %v110_v27 = vld [vmem:[#allocation2] sm:$0xff] }
  0x19   :  { %993 = vmatprep.subr.msk.mxu0 %vm75_vm2, %v1252_v18  ;;  %v1360_v33 = vand.u32 4294901760, %v1336_v26  ;;  %v1363_v34 = vadd.s32 %v1273_v2, %v35_v28  ;;  %v34_v36 = vadd.s32 48, %v1271_v1  ;;  %v827_v40 = vsel %vm72_vm5, 1.0, %v1253_v19 }
  0x1a   :  { %994 = vmatpush3.msk.msra.mxu0 %vm75_vm2, %v1252_v18  ;;  %v217_v37 = vsub.f32 %v1324_v23, %v1346_v29  ;;  %v224_v38 = vsub.f32 %v1327_v24, %v1349_v30  ;;  %v1376_v39 = vand.u32 4294901760, %v1351_v31  ;;  %vm70_vm7 = vcmp.eq.s32.totalorder %v1319_v22, 127 }
  0x1b   :  { %995 = vmatprep.subr.msk.mxu0 %vm74_vm3, %v1252_v18  ;;  %v231_v41 = vsub.f32 %v1336_v26, %v1360_v33  ;;  %v1388_v42 = vand.u32 4294901760, %v1365_v35  ;;  %v1391_v43 = vadd.s32 %v1273_v2, %v34_v36  ;;  %v1398_v47 = vsub.f32 %v827_v40, %v827_v40 }
  0x1c   :  { %996 = vmatpush3.msk.msra.mxu0 %vm74_vm3, %v1252_v18  ;;  %v218_v44 = vand.u32 4294901760, %v217_v37  ;;  %v225_v45 = vand.u32 4294901760, %v224_v38  ;;  %v238_v46 = vsub.f32 %v1351_v31, %v1376_v39  ;;  %vm69_vm8 = vcmp.eq.s32.totalorder %v1363_v34, 127 }
  0x1d   :  { %997 = vmatprep.subr.msk.mxu0 %vm73_vm4, %v1252_v18  ;;  %v232_v48 = vand.u32 4294901760, %v231_v41  ;;  %v245_v49 = vsub.f32 %v1365_v35, %v1388_v42  ;;  %v33_v50 = vadd.s32 40, %v1271_v1  ;;  %vm68_vm9 = vcmp.eq.s32.totalorder %v1391_v43, 127  ;;  %v111_v41 = vld [vmem:[#allocation2 + $0x8] sm:$0xff] }
  0x1e   :  { %998 = vmatpush3.msk.msra.mxu0 %vm73_vm4, %v1252_v18  ;;  %1024 = vmatprep.subr.mxu1 %v218_v44  ;;  %v1412_v51 = vand.u32 4294901760, %v1398_v47  ;;  %v826_v52 = vsel %vm71_vm6, 1.0, %v1253_v19  ;;  %v32_v53 = vadd.s32 32, %v1271_v1  ;;  %v239_v54 = vand.u32 4294901760, %v238_v46 }
  0x1f   :  { %999 = vmatprep.subr.msk.mxu0 %vm72_vm5, %v1252_v18  ;;  %1025 = vmatpush3.msra.mxu1 %v218_v44  ;;  %v1422_v55 = vadd.s32 %v1273_v2, %v33_v50  ;;  %v1424_v56 = vsub.f32 %v826_v52, %v826_v52  ;;  %v825_v57 = vsel %vm70_vm7, 1.0, %v1253_v19  ;;  %v31_v61 = vadd.s32 24, %v1271_v1 }
  0x20   :  { %1000 = vmatpush3.msk.msra.mxu0 %vm72_vm5, %v1252_v18  ;;  %1026 = vmatprep.subr.mxu1 %v225_v45  ;;  %v252_v58 = vsub.f32 %v1398_v47, %v1412_v51  ;;  %v1435_v59 = vadd.s32 %v1273_v2, %v32_v53  ;;  %v1437_v60 = vsub.f32 %v825_v57, %v825_v57  ;;  %v246_v62 = vand.u32 4294901760, %v245_v49 }
  0x21   :  { %1001 = vmatprep.subr.msk.mxu0 %vm71_vm6, %v1252_v18  ;;  %1027 = vmatpush3.msra.mxu1 %v225_v45  ;;  %v1444_v63 = vand.u32 4294901760, %v1424_v56  ;;  %v824_v0 = vsel %vm69_vm8, 1.0, %v1253_v19  ;;  %v30_v3 = vadd.s32 16, %v1271_v1  ;;  %vm67_vm10 = vcmp.eq.s32.totalorder %v1422_v55, 127 }
  0x22   :  { %1002 = vmatpush3.msk.msra.mxu0 %vm71_vm6, %v1252_v18  ;;  %1028 = vmatprep.subr.mxu1 %v232_v48  ;;  %v253_v4 = vand.u32 4294901760, %v252_v58  ;;  %v1455_v5 = vand.u32 4294901760, %v1437_v60  ;;  %v1458_v6 = vadd.s32 %v1273_v2, %v31_v61  ;;  %v1465_v8 = vsub.f32 %v824_v0, %v824_v0 }
  0x23   :  { %1003 = vmatprep.subr.msk.mxu0 %vm70_vm7, %v1252_v18  ;;  %1029 = vmatpush3.msra.mxu1 %v232_v48  ;;  %v259_v7 = vsub.f32 %v1424_v56, %v1444_v63  ;;  %v1468_v9 = vadd.s32 %v1273_v2, %v30_v3  ;;  %v823_v10 = vsel %vm68_vm9, 1.0, %v1253_v19  ;;  %vm66_vm11 = vcmp.eq.s32.totalorder %v1435_v59, 127 }
  0x24   :  { %1004 = vmatpush3.msk.msra.mxu0 %vm70_vm7, %v1252_v18  ;;  %1030 = vmatprep.subr.mxu1 %v239_v54  ;;  %v266_v20 = vsub.f32 %v1437_v60, %v1455_v5  ;;  %v1479_v21 = vsub.f32 %v823_v10, %v823_v10  ;;  %v29_v25 = vadd.s32 8, %v1271_v1  ;;  %vm65_vm12 = vcmp.eq.s32.totalorder %v1458_v6, 127 }
  0x25   :  { %1005 = vmatprep.subr.msk.mxu0 %vm69_vm8, %v1252_v18  ;;  %1031 = vmatpush3.msra.mxu1 %v239_v54  ;;  %v260_v28 = vand.u32 4294901760, %v259_v7  ;;  %v1487_v32 = vand.u32 4294901760, %v1465_v8  ;;  %v822_v36 = vsel %vm67_vm10, 1.0, %v1253_v19  ;;  %vm64_vm13 = vcmp.eq.s32.totalorder %v1468_v9, 127 }
  0x26   :  { %1006 = vmatpush3.msk.msra.mxu0 %vm69_vm8, %v1252_v18  ;;  %1032 = vmatprep.subr.mxu1 %v246_v62  ;;  %v1497_v37 = vand.u32 4294901760, %v1479_v21  ;;  %v1500_v38 = vadd.s32 %v1273_v2, %v29_v25  ;;  %v1502_v40 = vsub.f32 %v822_v36, %v822_v36  ;;  %v1511_v45 = vadd.s32 %v1273_v2, %v1271_v1 }
  0x27   :  { %1007 = vmatprep.subr.msk.mxu0 %vm68_vm9, %v1252_v18  ;;  %1033 = vmatpush3.msra.mxu1 %v246_v62  ;;  %v273_v44 = vsub.f32 %v1465_v8, %v1487_v32  ;;  %v821_v46 = vsel %vm66_vm11, 1.0, %v1253_v19  ;;  %v1516_v48 = vand.u32 4294901760, %v110_v27  ;;  %v267_v49 = vand.u32 4294901760, %v266_v20 }
  0x28   :  { %1008 = vmatpush3.msk.msra.mxu0 %vm68_vm9, %v1252_v18  ;;  %1034 = vmatprep.subr.mxu1 %v253_v4  ;;  %v280_v50 = vsub.f32 %v1479_v21, %v1497_v37  ;;  %v1524_v52 = vand.u32 4294901760, %v1502_v40  ;;  %v1526_v1 = vsub.f32 %v821_v46, %v821_v46  ;;  %vm63_vm14 = vcmp.eq.s32.totalorder %v1500_v38, 127 }
  0x29   :  { %1009 = vmatprep.subr.msk.mxu0 %vm67_vm10, %v1252_v18  ;;  %1035 = vmatpush3.msra.mxu1 %v253_v4  ;;  %v274_v2 = vand.u32 4294901760, %v273_v44  ;;  %v1533_v53 = vsub.f32 %v110_v27, %v1516_v48  ;;  %v1535_v54 = vand.u32 4294901760, %v111_v41  ;;  %vm62_vm15 = vcmp.eq.s32.totalorder %v1511_v45, 127 }
  0x2a   :  { %1010 = vmatpush3.msk.msra.mxu0 %vm67_vm10, %v1252_v18  ;;  %1036 = vmatprep.subr.mxu1 %v260_v28  ;;  %v287_v57 = vsub.f32 %v1502_v40, %v1524_v52  ;;  %v1544_v58 = vand.u32 4294901760, %v1526_v1  ;;  %v820_v61 = vsel %vm65_vm12, 1.0, %v1253_v19  ;;  %v819_v4 = vsel %vm64_vm13, 1.0, %v1253_v19 }
  0x2b   :  { %1011 = vmatprep.subr.msk.mxu0 %vm66_vm11, %v1252_v18  ;;  %1037 = vmatpush3.msra.mxu1 %v260_v28  ;;  %v1906_v62 = vand.u32 4294901760, %v1533_v53  ;;  %v1554_v0 = vsub.f32 %v111_v41, %v1535_v54  ;;  %v1556_v3 = vsub.f32 %v820_v61, %v820_v61  ;;  %v281_v7 = vand.u32 4294901760, %v280_v50 }
  0x2c   :  { %1012 = vmatpush3.msk.msra.mxu0 %vm66_vm11, %v1252_v18  ;;  %1038 = vmatprep.subr.mxu1 %v267_v49  ;;  %v294_v10 = vsub.f32 %v1526_v1, %v1544_v58  ;;  %v1566_v20 = vsub.f32 %v819_v4, %v819_v4  ;;  %v818_v25 = vsel %vm63_vm14, 1.0, %v1253_v19  ;;  %v288_v44 = vand.u32 4294901760, %v287_v57 }
  0x2d   :  { %1013 = vmatprep.subr.msk.mxu0 %vm65_vm12, %v1252_v18  ;;  %1039 = vmatpush3.msra.mxu1 %v267_v49  ;;  %v196_v27 = vsub.f32 %v1533_v53, %v1906_v62  ;;  %v1905_v28 = vand.u32 4294901760, %v1554_v0  ;;  %v1579_v36 = vand.u32 4294901760, %v1556_v3  ;;  %v1581_v41 = vsub.f32 %v818_v25, %v818_v25 }
  0x2e   :  { %1014 = vmatpush3.msk.msra.mxu0 %vm65_vm12, %v1252_v18  ;;  %1040 = vmatprep.subr.mxu1 %v274_v2  ;;  %v1587_v46 = vand.u32 4294901760, %v1566_v20  ;;  %v817_v49 = vsel %vm62_vm15, 1.0, %v1253_v19  ;;  %v295_v19 = vand.u32 4294901760, %v294_v10 }
  0x2f   :  { %1015 = vmatprep.subr.msk.mxu0 %vm64_vm13, %v1252_v18  ;;  %1041 = vmatpush3.msra.mxu1 %v274_v2  ;;  %v206_v50 = vsub.f32 %v1554_v0, %v1905_v28  ;;  %v301_v61 = vsub.f32 %v1556_v3, %v1579_v36  ;;  %v1601_v57 = vand.u32 4294901760, %v1581_v41  ;;  %v1606_v4 = vsub.f32 %v817_v49, %v817_v49 }
  0x30   :  { %1016 = vmatpush3.msk.msra.mxu0 %vm64_vm13, %v1252_v18  ;;  %1042 = vmatprep.subr.mxu1 %v281_v7  ;;  %v197_v2 = vand.u32 4294901760, %v196_v27  ;;  %v308_v25 = vsub.f32 %v1566_v20, %v1587_v46 }
  0x31   :  { %1017 = vmatprep.subr.msk.mxu0 %vm63_vm14, %v1252_v18  ;;  %1043 = vmatpush3.msra.mxu1 %v281_v7  ;;  %v207_v28 = vand.u32 4294901760, %v206_v50  ;;  %v1617_v62 = vand.u32 4294901760, %v1606_v4  ;;  %v302_v10 = vand.u32 4294901760, %v301_v61  ;;  %v315_v7 = vsub.f32 %v1581_v41, %v1601_v57 }
  0x32   :  { %1018 = vmatpush3.msk.msra.mxu0 %vm63_vm14, %v1252_v18  ;;  %1044 = vmatprep.subr.mxu1 %v288_v44  ;;  %v309_v27 = vand.u32 4294901760, %v308_v25 }
  0x33   :  { %1019 = vmatprep.subr.msk.mxu0 %vm62_vm15, %v1252_v18  ;;  %1045 = vmatpush3.msra.mxu1 %v288_v44  ;;  %v322_v49 = vsub.f32 %v1606_v4, %v1617_v62  ;;  %v316_v44 = vand.u32 4294901760, %v315_v7 }
  0x34   :  { %1020 = vmatpush3.msk.msra.mxu0 %vm62_vm15, %v1252_v18  ;;  %1046 = vmatprep.subr.mxu1 %v295_v19 }
  0x35   :  { %1021 = vmatprep.mubr.f32.mxu0 %v197_v2  ;;  %1047 = vmatpush3.msra.mxu1 %v295_v19  ;;  %v323_v50 = vand.u32 4294901760, %v322_v49 }
  0x36   :  { %1059 = vmatprep.subr.mxu0 %v1324_v23  ;;  %1022 = vmatmul.mubr.f32.vlgmr.msra.gmra.mxu0 %v207_v28 }
  0x37   :  { %1048 = vmatprep.subr.mxu1 %v302_v10  ;;  %1060 = vmatpush3.msra.mxu0 %v1324_v23  ;;  %v1907_v23 = vand.u32 4294901760, %v1533_v53 }
  0x38   :  { %1049 = vmatpush3.msra.mxu1 %v302_v10  ;;  %1061 = vmatprep.subr.mxu0 %v1327_v24 }
  0x39   :  { %1050 = vmatprep.subr.mxu1 %v309_v27  ;;  %1062 = vmatpush3.msra.mxu0 %v1327_v24  ;;  %v1908_v24 = vand.u32 4294901760, %v1554_v0 }
  0x3a   :  { %1051 = vmatpush3.msra.mxu1 %v309_v27  ;;  %1063 = vmatprep.subr.mxu0 %v1336_v26 }
  0x3b   :  { %1052 = vmatprep.subr.mxu1 %v316_v44  ;;  %1064 = vmatpush3.msra.mxu0 %v1336_v26 }
  0x3c   :  { %1053 = vmatpush3.msra.mxu1 %v316_v44  ;;  %1065 = vmatprep.subr.mxu0 %v1351_v31 }
  0x3d   :  { %1054 = vmatprep.subr.mxu1 %v323_v50  ;;  %1066 = vmatpush3.msra.mxu0 %v1351_v31 }
  0x3e   :  { %1055 = vmatpush3.msra.mxu1 %v323_v50  ;;  %1056 = vmatprep.mubr.f32.mxu1 %v1516_v48 }
  0x3f   :  { %1067 = vmatprep.subr.mxu0 %v1365_v35  ;;  %1057 = vmatmul.mubr.f32.vlgmr.msra.gmra.mxu1 %v1535_v54 }
  0x40   :  { %1068 = vmatpush3.msra.mxu0 %v1365_v35  ;;  %1094 = vmatprep.subr.msk.mxu1 %vm77_vm0, %v1252_v18 }
  0x41   :  { %1069 = vmatprep.subr.mxu0 %v1398_v47  ;;  %1095 = vmatpush3.msk.msra.mxu1 %vm77_vm0, %v1252_v18 }
  0x42   :  { %1070 = vmatpush3.msra.mxu0 %v1398_v47  ;;  %1096 = vmatprep.subr.msk.mxu1 %vm76_vm1, %v1252_v18 }
  0x43   :  { %1071 = vmatprep.subr.mxu0 %v1424_v56  ;;  %1097 = vmatpush3.msk.msra.mxu1 %vm76_vm1, %v1252_v18 }
  0x44   :  { %1072 = vmatpush3.msra.mxu0 %v1424_v56  ;;  %1098 = vmatprep.subr.msk.mxu1 %vm75_vm2, %v1252_v18 }
  0x45   :  { %1073 = vmatprep.subr.mxu0 %v1437_v60  ;;  %1099 = vmatpush3.msk.msra.mxu1 %vm75_vm2, %v1252_v18 }
  0x46   :  { %1074 = vmatpush3.msra.mxu0 %v1437_v60  ;;  %1100 = vmatprep.subr.msk.mxu1 %vm74_vm3, %v1252_v18 }
  0x47   :  { %1075 = vmatprep.subr.mxu0 %v1465_v8  ;;  %1101 = vmatpush3.msk.msra.mxu1 %vm74_vm3, %v1252_v18 }
  0x48   :  { %1076 = vmatpush3.msra.mxu0 %v1465_v8  ;;  %1102 = vmatprep.subr.msk.mxu1 %vm73_vm4, %v1252_v18 }
  0x49   :  { %1077 = vmatprep.subr.mxu0 %v1479_v21  ;;  %1103 = vmatpush3.msk.msra.mxu1 %vm73_vm4, %v1252_v18 }
  0x4a   :  { %1078 = vmatpush3.msra.mxu0 %v1479_v21  ;;  %1104 = vmatprep.subr.msk.mxu1 %vm72_vm5, %v1252_v18 }
  0x4b   :  { %1079 = vmatprep.subr.mxu0 %v1502_v40  ;;  %1105 = vmatpush3.msk.msra.mxu1 %vm72_vm5, %v1252_v18 }
  0x4c   :  { %1080 = vmatpush3.msra.mxu0 %v1502_v40  ;;  %1106 = vmatprep.subr.msk.mxu1 %vm71_vm6, %v1252_v18 }
  0x4d   :  { %1081 = vmatprep.subr.mxu0 %v1526_v1  ;;  %1107 = vmatpush3.msk.msra.mxu1 %vm71_vm6, %v1252_v18 }
  0x4e   :  { %1082 = vmatpush3.msra.mxu0 %v1526_v1  ;;  %1108 = vmatprep.subr.msk.mxu1 %vm70_vm7, %v1252_v18 }
  0x4f   :  { %1083 = vmatprep.subr.mxu0 %v1556_v3  ;;  %1109 = vmatpush3.msk.msra.mxu1 %vm70_vm7, %v1252_v18 }
  0x50   :  { %1084 = vmatpush3.msra.mxu0 %v1556_v3  ;;  %1110 = vmatprep.subr.msk.mxu1 %vm69_vm8, %v1252_v18 }
  0x51   :  { %1085 = vmatprep.subr.mxu0 %v1566_v20  ;;  %1111 = vmatpush3.msk.msra.mxu1 %vm69_vm8, %v1252_v18 }
  0x52   :  { %1086 = vmatpush3.msra.mxu0 %v1566_v20  ;;  %1112 = vmatprep.subr.msk.mxu1 %vm68_vm9, %v1252_v18 }
  0x53   :  { %1087 = vmatprep.subr.mxu0 %v1581_v41  ;;  %1113 = vmatpush3.msk.msra.mxu1 %vm68_vm9, %v1252_v18 }
  0x54   :  { %1088 = vmatpush3.msra.mxu0 %v1581_v41  ;;  %1114 = vmatprep.subr.msk.mxu1 %vm67_vm10, %v1252_v18 }
  0x55   :  { %1089 = vmatprep.subr.mxu0 %v1606_v4  ;;  %1115 = vmatpush3.msk.msra.mxu1 %vm67_vm10, %v1252_v18 }
  0x56   :  { %1090 = vmatpush3.msra.mxu0 %v1606_v4  ;;  %1091 = vmatprep.mubr.f32.mxu0 %v1533_v53 }
  0x57   :  { %1116 = vmatprep.subr.msk.mxu1 %vm66_vm11, %v1252_v18  ;;  %1092 = vmatmul.mubr.f32.vlgmr.msra.gmra.mxu0 %v1554_v0 }
  0x58   :  { %1117 = vmatpush3.msk.msra.mxu1 %vm66_vm11, %v1252_v18  ;;  %1129 = vmatprep.subr.mxu0 %v1346_v29 }
  0x59   :  { %1118 = vmatprep.subr.msk.mxu1 %vm65_vm12, %v1252_v18  ;;  %1130 = vmatpush3.msra.mxu0 %v1346_v29 }
  0x5a   :  { %1119 = vmatpush3.msk.msra.mxu1 %vm65_vm12, %v1252_v18  ;;  %1131 = vmatprep.subr.mxu0 %v1349_v30 }
  0x5b   :  { %1120 = vmatprep.subr.msk.mxu1 %vm64_vm13, %v1252_v18  ;;  %1132 = vmatpush3.msra.mxu0 %v1349_v30 }
  0x5c   :  { %1121 = vmatpush3.msk.msra.mxu1 %vm64_vm13, %v1252_v18  ;;  %1133 = vmatprep.subr.mxu0 %v1360_v33 }
  0x5d   :  { %1122 = vmatprep.subr.msk.mxu1 %vm63_vm14, %v1252_v18  ;;  %1134 = vmatpush3.msra.mxu0 %v1360_v33 }
  0x5e   :  { %1123 = vmatpush3.msk.msra.mxu1 %vm63_vm14, %v1252_v18  ;;  %1135 = vmatprep.subr.mxu0 %v1376_v39 }
  0x5f   :  { %1124 = vmatprep.subr.msk.mxu1 %vm62_vm15, %v1252_v18  ;;  %1136 = vmatpush3.msra.mxu0 %v1376_v39 }
  0x60   :  { %1125 = vmatpush3.msk.msra.mxu1 %vm62_vm15, %v1252_v18  ;;  %1126 = vmatprep.mubr.f32.mxu1 %v1907_v23 }
  0x61   :  { %1137 = vmatprep.subr.mxu0 %v1388_v42  ;;  %1127 = vmatmul.mubr.f32.vlgmr.msra.gmra.mxu1 %v1908_v24 }
  0x62   :  { %1138 = vmatpush3.msra.mxu0 %v1388_v42  ;;  %1164 = vmatprep.subr.msk.mxu1 %vm77_vm0, %v1252_v18 }
  0x63   :  { %1139 = vmatprep.subr.mxu0 %v1412_v51  ;;  %1165 = vmatpush3.msk.msra.mxu1 %vm77_vm0, %v1252_v18 }
  0x64   :  { %1140 = vmatpush3.msra.mxu0 %v1412_v51  ;;  %1166 = vmatprep.subr.msk.mxu1 %vm76_vm1, %v1252_v18 }
  0x65   :  { %1141 = vmatprep.subr.mxu0 %v1444_v63  ;;  %1167 = vmatpush3.msk.msra.mxu1 %vm76_vm1, %v1252_v18 }
  0x66   :  { %1142 = vmatpush3.msra.mxu0 %v1444_v63  ;;  %1168 = vmatprep.subr.msk.mxu1 %vm75_vm2, %v1252_v18 }
  0x67   :  { %1143 = vmatprep.subr.mxu0 %v1455_v5  ;;  %1169 = vmatpush3.msk.msra.mxu1 %vm75_vm2, %v1252_v18 }
  0x68   :  { %1144 = vmatpush3.msra.mxu0 %v1455_v5  ;;  %1170 = vmatprep.subr.msk.mxu1 %vm74_vm3, %v1252_v18 }
  0x69   :  { %1145 = vmatprep.subr.mxu0 %v1487_v32  ;;  %1171 = vmatpush3.msk.msra.mxu1 %vm74_vm3, %v1252_v18 }
  0x6a   :  { %1146 = vmatpush3.msra.mxu0 %v1487_v32  ;;  %1172 = vmatprep.subr.msk.mxu1 %vm73_vm4, %v1252_v18 }
  0x6b   :  { %1147 = vmatprep.subr.mxu0 %v1497_v37  ;;  %1173 = vmatpush3.msk.msra.mxu1 %vm73_vm4, %v1252_v18 }
  0x6c   :  { %1148 = vmatpush3.msra.mxu0 %v1497_v37  ;;  %1174 = vmatprep.subr.msk.mxu1 %vm72_vm5, %v1252_v18 }
  0x6d   :  { %1149 = vmatprep.subr.mxu0 %v1524_v52  ;;  %1175 = vmatpush3.msk.msra.mxu1 %vm72_vm5, %v1252_v18 }
  0x6e   :  { %1150 = vmatpush3.msra.mxu0 %v1524_v52  ;;  %1176 = vmatprep.subr.msk.mxu1 %vm71_vm6, %v1252_v18 }
  0x6f   :  { %1151 = vmatprep.subr.mxu0 %v1544_v58  ;;  %1177 = vmatpush3.msk.msra.mxu1 %vm71_vm6, %v1252_v18 }
  0x70   :  { %1152 = vmatpush3.msra.mxu0 %v1544_v58  ;;  %1178 = vmatprep.subr.msk.mxu1 %vm70_vm7, %v1252_v18 }
  0x71   :  { %1153 = vmatprep.subr.mxu0 %v1579_v36  ;;  %1179 = vmatpush3.msk.msra.mxu1 %vm70_vm7, %v1252_v18 }
  0x72   :  { %1154 = vmatpush3.msra.mxu0 %v1579_v36  ;;  %1180 = vmatprep.subr.msk.mxu1 %vm69_vm8, %v1252_v18 }
  0x73   :  { %1155 = vmatprep.subr.mxu0 %v1587_v46  ;;  %1181 = vmatpush3.msk.msra.mxu1 %vm69_vm8, %v1252_v18 }
  0x74   :  { %1156 = vmatpush3.msra.mxu0 %v1587_v46  ;;  %1182 = vmatprep.subr.msk.mxu1 %vm68_vm9, %v1252_v18 }
  0x75   :  { %1157 = vmatprep.subr.mxu0 %v1601_v57  ;;  %1183 = vmatpush3.msk.msra.mxu1 %vm68_vm9, %v1252_v18 }
  0x76   :  { %1158 = vmatpush3.msra.mxu0 %v1601_v57  ;;  %1184 = vmatprep.subr.msk.mxu1 %vm67_vm10, %v1252_v18 }
  0x77   :  { %1159 = vmatprep.subr.mxu0 %v1617_v62  ;;  %1185 = vmatpush3.msk.msra.mxu1 %vm67_vm10, %v1252_v18 }
  0x78   :  { %1160 = vmatpush3.msra.mxu0 %v1617_v62  ;;  %1161 = vmatprep.mubr.f32.mxu0 %v1516_v48 }
  0x79   :  { %1186 = vmatprep.subr.msk.mxu1 %vm66_vm11, %v1252_v18  ;;  %1162 = vmatmul.mubr.f32.vlgmr.msra.gmra.mxu0 %v1535_v54 }
  0x7a   :  { %1187 = vmatpush3.msk.msra.mxu1 %vm66_vm11, %v1252_v18  ;;  %1196 = vmatprep.mubr.f32.mxu1 %v1516_v48 }
  0x7b   :  { %1188 = vmatprep.subr.msk.mxu1 %vm65_vm12, %v1252_v18 }
  0x7c   :  { %1189 = vmatpush3.msk.msra.mxu1 %vm65_vm12, %v1252_v18 }
  0x7d   :  { %1190 = vmatprep.subr.msk.mxu1 %vm64_vm13, %v1252_v18 }
  0x7e   :  { %1191 = vmatpush3.msk.msra.mxu1 %vm64_vm13, %v1252_v18 }
  0x7f   :  { %1192 = vmatprep.subr.msk.mxu1 %vm63_vm14, %v1252_v18 }
  0x80   :  { %1193 = vmatpush3.msk.msra.mxu1 %vm63_vm14, %v1252_v18 }
  0x81   :  { %1194 = vmatprep.subr.msk.mxu1 %vm62_vm15, %v1252_v18 }
  0x82   :  { %1195 = vmatpush3.msk.msra.mxu1 %vm62_vm15, %v1252_v18 }
  0x83   :  { %1197 = vmatmul.mubr.f32.vlgmr.msra.gmra.mxu1 %v1535_v54 }
  0xf6   :  { %v1023_v11 = vpop.f32.mrf.mxu0 }
  0xf8   :  { %v199_v12 = vpop.f32.mrf.mxu0 }
  0xff   :  { %v1058_v13 = vpop.f32.mrf.mxu1 }
 0x100   :  { %v367_v22 = vadd.f32 %v1058_v13, %v1023_v11 }
 0x101   :  { %v360_v15 = vpop.f32.mrf.mxu1 }
 0x102   :  { %v361_v29 = vadd.f32 %v360_v15, %v199_v12 }
 0x117   :  { %v1093_v14 = vpop.f32.mrf.mxu0 }
 0x118   :  { %v478_v30 = vadd.f32 %v1093_v14, %v367_v22 }
 0x119   :  { %v470_v16 = vpop.f32.mrf.mxu0 }
 0x11a   :  { %v471_v33 = vadd.f32 %v470_v16, %v361_v29 }
 0x121   :  { %v1128_v17 = vpop.f32.mrf.mxu1 }
 0x122   :  { %v575_v34 = vadd.f32 %v1128_v17, %v478_v30 }
 0x123   :  { %v566_v31 = vpop.f32.mrf.mxu1 }
 0x124   :  { %v567_v39 = vadd.f32 %v566_v31, %v471_v33 }
 0x139   :  { %v1163_v26 = vpop.f32.mrf.mxu0 }
 0x13a   :  { %v700_v42 = vadd.f32 %v1163_v26, %v575_v34 }
 0x13b   :  { %v693_v35 = vpop.f32.mrf.mxu0 }
 0x13c   :  { %v694_v43 = vadd.f32 %v693_v35, %v567_v39 }
 0x143   :  { %v1198_v18 = vpop.f32.mrf.mxu1 }
 0x144   :  { %v793_v47 = vadd.f32 %v1198_v18, %v700_v42 }
 0x145   :  { %v786_v51 = vpop.f32.mrf.mxu1 }
 0x146   :  { %797 = vst [vmem:[#allocation5 + $0x8] sm:$0xff] %v793_v47  ;;  %v787_v55 = vadd.f32 %v786_v51, %v694_v43 }
 0x148   :  { %796 = vst [vmem:[#allocation5] sm:$0xff] %v787_v55 }
 0x149   :  { %1236 = shalt.err (!%p1233_p9)
}
 0x14a   :  { %809 = dma.vmem_to_hbm [thread:$0]  %s804_s13, 256, %s1904_s1, [#allocation4], %s1250_s9, %s1250_s9, %s1251_s10  }
 0x14b   :  { %1247 = dma.done.wait [#allocation4], 256  }
 0x14c   :  { %1248 = vsyncadd [#allocation4], 4294967040 }
 0x14d   :  { %813 = vsyncpa [#allocation3], 1 }
 0x14e   :  { %814 = vsyncpa [#allocation4], 1 }

</bundles_post_ra>
